<compile_context>
chip_gen: v5e
topology: v5e:2x2
jax: 0.10.0
libtpu: 0.0.40
codegen_flags: <defaults>
</compile_context>

<pallas_src>
import functools

import jax
import jax.numpy as jnp
from jax import lax
from jax.experimental import pallas as pl
from jax.experimental.pallas import tpu as pltpu


# ---------------------------------------------------------------------------
# Kernel
# ---------------------------------------------------------------------------
def _topk_abs_kernel(x_ref, o_ref, *, topk: int, chunk_rows: int, compute_dtype):
    bm, d = x_ref.shape
    num_chunks = bm // chunk_rows
    neg_inf = jnp.asarray(-jnp.inf, dtype=compute_dtype)
    # Hoisted once; reused by every chunk / top-k step (no per-iter re-broadcast).
    col = lax.broadcasted_iota(jnp.int32, (chunk_rows, d), 1)

    def process_chunk(c, carry):
        r0 = pl.multiple_of(c * chunk_rows, chunk_rows)
        x = x_ref[pl.ds(r0, chunk_rows), :]          # (cr, D) in input dtype
        rem0 = jnp.abs(x).astype(compute_dtype)      # (cr, D) register-resident

        def step(_, rem):
            # One cross-lane reduction per step; argmax tie-breaks by lowest
            # column index (matches lax.top_k / torch.topk ordering).
            idx = jnp.argmax(rem, axis=-1, keepdims=True).astype(jnp.int32)
            return jnp.where(col == idx, neg_inf, rem)

        rem = lax.fori_loop(0, topk, step, rem0,
                            unroll=True if topk <= 8 else 4)

        # Selected positions were overwritten with -inf (|x| is never -inf).
        keep = jnp.isneginf(rem)
        o_ref[pl.ds(r0, chunk_rows), :] = jnp.where(keep, x, jnp.zeros_like(x))
        return carry

    lax.fori_loop(0, num_chunks, process_chunk, 0)


# ---------------------------------------------------------------------------
# Tiling helpers
# ---------------------------------------------------------------------------
def _round_up(v: int, m: int) -> int:
    return ((v + m - 1) // m) * m


def _round_down(v: int, m: int) -> int:
    return (v // m) * m


def _sublane_rows(itemsize: int) -> int:
    # 8 sublanes for 4-byte, 16 for 2-byte, 32 for 1-byte packed dtypes.
    return {4: 8, 2: 16, 1: 32}.get(itemsize, 8)


def _vmem_capacity_bytes() -> int:
    try:
        cap = getattr(pltpu.get_tpu_info(), "vmem_capacity_bytes", None)
        if cap:
            return int(cap)
    except Exception:
        pass
    return 64 * 1024 * 1024  # conservative (v7x-sized) fallback


# ---------------------------------------------------------------------------
# Wrapper
# ---------------------------------------------------------------------------
def topk_absolutes_1d(x: jax.Array, topk: int, *, block_rows: int = 1024) -> jax.Array:
    """Zero all but the top-k |value| entries along the last axis."""
    orig_shape = x.shape
    if len(orig_shape) == 0:
        raise ValueError("topk_absolutes_1d requires at least 1 dimension")
    d = orig_shape[-1]
    if not (0 <= topk <= d):
        raise ValueError(f"topk={topk} out of range for last dim of size {d}")
    if topk == 0:
        return jnp.zeros_like(x)

    x2 = x.reshape(-1, d)
    n = x2.shape[0]
    if n == 0:
        return x

    in_dtype = jnp.dtype(x2.dtype)
    # Native compute for f32 / bf16 (v6e/v7x bf16 VPU/XLU); upcast anything else.
    if in_dtype in (jnp.dtype(jnp.float32), jnp.dtype(jnp.bfloat16)):
        compute_dtype = x2.dtype
    else:
        compute_dtype = jnp.float32
    in_item = in_dtype.itemsize
    comp_item = jnp.dtype(compute_dtype).itemsize

    sub = _sublane_rows(in_item)

    # Register-resident chunk rows: keep `rem` around <= 32 KiB (~8 vregs).
    cr = max(sub, _round_down((32 * 1024) // max(d * comp_item, 1), sub))
    cr = min(cr, _round_up(n, sub))

    # VMEM tile budget per generation (double-buffered in+out tiles dominate).
    vmem_cap = _vmem_capacity_bytes()
    tile_budget = max(8 * 1024 * 1024, vmem_cap // 4)
    bytes_per_row = 4 * d * in_item                     # 2 buffers x (in + out)
    cap_rows = max(cr, _round_down(tile_budget // max(bytes_per_row, 1), cr))
    bm = max(cr, min(_round_up(block_rows, cr), cap_rows))
    # Keep the grid multi-step (megacore sharding + DMA/compute overlap).
    steps_target = 8
    bm = max(cr, min(bm, _round_up(-(-n // steps_target), cr)))

    grid = (pl.cdiv(n, bm),)   # partial last block handled by Pallas (no host pad)

    # VMEM limit from estimated usage (+ headroom), clamped to chip capacity.
    est = 4 * bm * d * in_item + cr * d * (in_item + 3 * comp_item + 8)
    vmem_limit = int(min(max(2 * est + (4 << 20), 16 << 20),
                         max(vmem_cap - (16 << 20), 32 << 20)))

    out = pl.pallas_call(
        functools.partial(_topk_abs_kernel, topk=int(topk), chunk_rows=cr,
                          compute_dtype=compute_dtype),
        out_shape=jax.ShapeDtypeStruct((n, d), x.dtype),
        grid_spec=pltpu.PrefetchScalarGridSpec(
            num_scalar_prefetch=0,
            grid=grid,
            in_specs=[pl.BlockSpec((bm, d), lambda i: (i, 0))],
            out_specs=pl.BlockSpec((bm, d), lambda i: (i, 0)),
        ),
        compiler_params=pltpu.CompilerParams(
            dimension_semantics=("parallel",),
            vmem_limit_bytes=vmem_limit),
    )(x2)

    return out.reshape(orig_shape)


class TopKAbsolutes1D:
    """JAX/Pallas equivalent of the torch TopKAbsolutes1D module (no params)."""

    def __init__(self, topk: int) -> None:
        self.topk = topk

    def __call__(self, x: jax.Array) -> jax.Array:
        return topk_absolutes_1d(x, self.topk)


def _reference(x: jax.Array, topk: int) -> jax.Array:
    # Pure-JAX reference for sanity checking.
    _, idx = lax.top_k(jnp.abs(x), topk)
    vals = jnp.take_along_axis(x, idx, axis=-1)
    out = jnp.zeros_like(x)
    return jnp.put_along_axis(out, idx, vals, axis=-1, inplace=False)


if __name__ == "__main__":
    topk = 4
    mod = TopKAbsolutes1D(topk)

    # Primary example: (batch=2, seq=8, hidden=128) -> 16 rows, lane-dense D.
    x = jax.random.normal(jax.random.PRNGKey(0), (2, 8, 128), dtype=jnp.float32)
    y = mod(x)
    jax.block_until_ready(y)
    assert y.shape == x.shape and y.dtype == x.dtype
    assert jnp.array_equal(y, _reference(x, topk)), "mismatch vs reference"
    assert bool(jnp.all(jnp.sum(y != 0, axis=-1) == topk))

    # Row count not a multiple of the sublane tile: exercises the partial last
    # block (no host-side padding copy, no output slice).
    x2 = jax.random.normal(jax.random.PRNGKey(1), (3, 5, 128), dtype=jnp.float32)
    y2 = topk_absolutes_1d(x2, topk)
    jax.block_until_ready(y2)
    assert jnp.array_equal(y2, _reference(x2, topk)), "mismatch (partial block)"
    assert bool(jnp.all(jnp.sum(y2 != 0, axis=-1) == topk))

    # Larger case: multi-step grid + multiple in-kernel chunks per block.
    x3 = jax.random.normal(jax.random.PRNGKey(2), (8, 64, 256), dtype=jnp.float32)
    y3 = topk_absolutes_1d(x3, 7)
    jax.block_until_ready(y3)
    assert jnp.array_equal(y3, _reference(x3, 7)), "mismatch (large case)"
    assert bool(jnp.all(jnp.sum(y3 != 0, axis=-1) == 7))

    # topk > 8: exercises the partially-unrolled (unroll=4) top-k loop.
    x4 = jax.random.normal(jax.random.PRNGKey(3), (4, 128), dtype=jnp.float32)
    y4 = topk_absolutes_1d(x4, 12)
    jax.block_until_ready(y4)
    assert jnp.array_equal(y4, _reference(x4, 12)), "mismatch (topk=12)"
    assert bool(jnp.all(jnp.sum(y4 != 0, axis=-1) == 12))

    print("KERNEL_OK")
</pallas_src>

<mosaic_0001>
module attributes {stable_mosaic.version = 11 : i64} {
  func.func @_topk_abs_kernel(%arg0: i32, %arg1: memref<16x128xf32, #tpu.memory_space<vmem>>, %arg2: memref<16x128xf32, #tpu.memory_space<vmem>>) attributes {dimension_semantics = [#tpu.dimension_semantics<parallel>], iteration_bounds = array<i64: 1>, scalar_prefetch = 0 : i64, scratch_operands = 0 : i64, tpu.core_type = #tpu.core_type<tc>, window_params = [{transform_indices = @transform_0, window_bounds = array<i64: 16, 128>}, {transform_indices = @transform_1, window_bounds = array<i64: 16, 128>}]} {
    %0 = tpu.iota {dimensions = array<i32: 1>} : vector<16x128xi32>
    %cst = arith.constant 0xFF800000 : f32
    %c0_i32 = arith.constant 0 : i32
    %c16_i32 = arith.constant 16 : i32
    %1 = arith.muli %c0_i32, %c16_i32 : i32
    %2 = tpu.assume_multiple %1, 16 : i32
    %3 = arith.index_cast %2 : i32 to index
    %c0 = arith.constant 0 : index
    %4 = vector.load %arg1[%3, %c0] : memref<16x128xf32, #tpu.memory_space<vmem>>, vector<16x128xf32>
    %5 = math.absf %4 : vector<16x128xf32>
    %c0_i32_0 = arith.constant 0 : i32
    %6 = tpu.reduce_index %5 {axis = 1 : i32, kind = #tpu.reduction_kind<arg_max>} : vector<16x128xf32> -> vector<16xi32>
    %7 = vector.shape_cast %6 : vector<16xi32> to vector<16x1xi32>
    %8 = vector.broadcast %7 : vector<16x1xi32> to vector<16x128xi32>
    %9 = arith.cmpi eq, %0, %8 : vector<16x128xi32>
    %10 = vector.broadcast %cst : f32 to vector<16x128xf32>
    %11 = arith.select %9, %10, %5 : vector<16x128xi1>, vector<16x128xf32>
    %c1_i32 = arith.constant 1 : i32
    %12 = tpu.reduce_index %11 {axis = 1 : i32, kind = #tpu.reduction_kind<arg_max>} : vector<16x128xf32> -> vector<16xi32>
    %13 = vector.shape_cast %12 : vector<16xi32> to vector<16x1xi32>
    %14 = vector.broadcast %13 : vector<16x1xi32> to vector<16x128xi32>
    %15 = arith.cmpi eq, %0, %14 : vector<16x128xi32>
    %16 = vector.broadcast %cst : f32 to vector<16x128xf32>
    %17 = arith.select %15, %16, %11 : vector<16x128xi1>, vector<16x128xf32>
    %c2_i32 = arith.constant 2 : i32
    %18 = tpu.reduce_index %17 {axis = 1 : i32, kind = #tpu.reduction_kind<arg_max>} : vector<16x128xf32> -> vector<16xi32>
    %19 = vector.shape_cast %18 : vector<16xi32> to vector<16x1xi32>
    %20 = vector.broadcast %19 : vector<16x1xi32> to vector<16x128xi32>
    %21 = arith.cmpi eq, %0, %20 : vector<16x128xi32>
    %22 = vector.broadcast %cst : f32 to vector<16x128xf32>
    %23 = arith.select %21, %22, %17 : vector<16x128xi1>, vector<16x128xf32>
    %c3_i32 = arith.constant 3 : i32
    %24 = tpu.reduce_index %23 {axis = 1 : i32, kind = #tpu.reduction_kind<arg_max>} : vector<16x128xf32> -> vector<16xi32>
    %25 = vector.shape_cast %24 : vector<16xi32> to vector<16x1xi32>
    %26 = vector.broadcast %25 : vector<16x1xi32> to vector<16x128xi32>
    %27 = arith.cmpi eq, %0, %26 : vector<16x128xi32>
    %28 = vector.broadcast %cst : f32 to vector<16x128xf32>
    %29 = arith.select %27, %28, %23 : vector<16x128xi1>, vector<16x128xf32>
    %cst_1 = arith.constant 0xFF800000 : f32
    %30 = vector.broadcast %cst_1 : f32 to vector<16x128xf32>
    %31 = arith.cmpf oeq, %29, %30 : vector<16x128xf32>
    %cst_2 = arith.constant 0.000000e+00 : f32
    %32 = vector.broadcast %cst_2 : f32 to vector<16x128xf32>
    %33 = arith.select %31, %4, %32 : vector<16x128xi1>, vector<16x128xf32>
    %34 = arith.index_cast %2 : i32 to index
    %c0_3 = arith.constant 0 : index
    %35 = vector.load %arg2[%34, %c0_3] : memref<16x128xf32, #tpu.memory_space<vmem>>, vector<16x128xf32>
    tpu.vector_store %arg2[%34, %c0_3], %33 {strides = array<i32>} : memref<16x128xf32, #tpu.memory_space<vmem>>, vector<16x128xf32>,
    %c1_i32_4 = arith.constant 1 : i32
    return
  }
  func.func @transform_0(%arg0: i32) -> (i32, i32) {
    %c0_i32 = arith.constant 0 : i32
    %c0_i32_0 = arith.constant 0 : i32
    return %arg0, %c0_i32 : i32, i32
  }
  func.func @transform_1(%arg0: i32) -> (i32, i32) {
    %c0_i32 = arith.constant 0 : i32
    %c0_i32_0 = arith.constant 0 : i32
    return %arg0, %c0_i32 : i32, i32
  }
}

</mosaic_0001>

<bundles_post_ra>
// kernel: tpu_custom_call.1
= control target key start
LH: loop header
LB: loop body
LE: loop exit
PB: predicated region body
PF: predicated region fallthrough
CT: control target
= control target key end

     0   :  { %6 = vsyncpa [#allocation3], 0  ;;  %s170_s0 = inlined_call_operand.hbm [shape: f32[16,128], index: 0, kind: input, shape index: {}]   ;;  %s171_s1 = inlined_call_operand.hbm [shape: f32[16,128], index: 1, kind: output, shape index: {}]  }
   0x1   :  { %7 = vsyncpa [#allocation4], 0  ;;  %s12_s8 = sshll.u32 %s170_s0, 4  ;;  %s144_s9 = smov [#allocation2]   ;;  %s13_s8 = int_to_ptr.hbm [resolvable:$true] %s12_s8 }
   0x2   :  { %s14_s10 = sshll.u32 %s144_s9, 4  ;;  %s145_s11 = smov 128   ;;  %s15_s10 = int_to_ptr.vmem [resolvable:$true] %s14_s10 }
   0x3   :  { %s146_s12 = smov 8  }
   0x4   :  { %20 = dma.hbm_to_vmem [thread:$0]  %s13_s8, 256, %s15_s10, [#allocation3], %s145_s11, %s145_s11, %s146_s12  }
   0x5   :  { %140 = dma.done.wait [#allocation3], 256  }
   0x6   :  { %141 = vsyncadd [#allocation3], 4294967040  ;;  %v27_v0 = vld [vmem:[#allocation2] sm:$0xff]  ;;  %v28_v2 = vld [vmem:[#allocation2 + $0x8] sm:$0xff]  ;;  %v25_v4 = vlaneseq  ;;  %s147_s0 = smov [#allocation5]   ;;  %s75_s16 = sshll.u32 %s171_s1, 4  ;;  %s76_s16 = int_to_ptr.hbm [resolvable:$true] %s75_s16 }
   0x7   :  { %v29_v1 = vand.u32 2147483647, %v27_v0  ;;  %v30_v3 = vand.u32 2147483647, %v28_v2  ;;  %s73_s13 = sshll.u32 %s147_s0, 4  ;;  %s74_s13 = int_to_ptr.vmem [resolvable:$true] %s73_s13 }
   0x8   :  { %v26_v5 = vand.u32 127, %v25_v4 }
   0x9   :  { %31 = vmax.index.xlane.f32.xlu0 %v29_v1 }
  0x11   :  { %33 = vmax.index.xlane.f32.xlu0 %v30_v3 }
  0x7c   :  { %v32_v6 = vpop.xlane.xlu0 %31 }
  0x7d   :  { %vm35_vm0 = vcmp.eq.s32.totalorder %v26_v5, %v32_v6 }
  0x7e   :  { %v37_v7 = vsel %vm35_vm0, -inf, %v29_v1 }
  0x7f   :  { %39 = vmax.index.xlane.f32.xlu1 %v37_v7 }
  0x84   :  { %v34_v8 = vpop.xlane.xlu0 %33 }
  0x85   :  { %vm36_vm1 = vcmp.eq.s32.totalorder %v26_v5, %v34_v8 }
  0x86   :  { %v38_v9 = vsel %vm36_vm1, -inf, %v30_v3 }
  0x87   :  { %41 = vmax.index.xlane.f32.xlu1 %v38_v9 }
  0xf2   :  { %v40_v10 = vpop.xlane.xlu1 %39 }
  0xf3   :  { %vm43_vm2 = vcmp.eq.s32.totalorder %v26_v5, %v40_v10 }
  0xf4   :  { %v45_v11 = vsel %vm43_vm2, -inf, %v37_v7 }
  0xf5   :  { %47 = vmax.index.xlane.f32.xlu2 %v45_v11 }
  0xfa   :  { %v42_v12 = vpop.xlane.xlu1 %41 }
  0xfb   :  { %vm44_vm3 = vcmp.eq.s32.totalorder %v26_v5, %v42_v12 }
  0xfc   :  { %v46_v13 = vsel %vm44_vm3, -inf, %v38_v9 }
  0xfd   :  { %49 = vmax.index.xlane.f32.xlu2 %v46_v13 }
 0x168   :  { %v48_v14 = vpop.xlane.xlu2 %47 }
 0x169   :  { %vm51_vm4 = vcmp.eq.s32.totalorder %v26_v5, %v48_v14 }
 0x16a   :  { %v53_v15 = vsel %vm51_vm4, -inf, %v45_v11 }
 0x16b   :  { %55 = vmax.index.xlane.f32.xlu0 %v53_v15 }
 0x170   :  { %v50_v16 = vpop.xlane.xlu2 %49 }
 0x171   :  { %vm52_vm5 = vcmp.eq.s32.totalorder %v26_v5, %v50_v16 }
 0x172   :  { %v54_v17 = vsel %vm52_vm5, -inf, %v46_v13 }
 0x173   :  { %57 = vmax.index.xlane.f32.xlu1 %v54_v17 }
 0x1de   :  { %v56_v18 = vpop.xlane.xlu0 %55 }
 0x1df   :  { %vm59_vm6 = vcmp.eq.s32.totalorder %v26_v5, %v56_v18 }
 0x1e0   :  { %v61_v19 = vsel %vm59_vm6, -inf, %v53_v15 }
 0x1e1   :  { %vm63_vm7 = vcmp.eq.f32.partialorder %v61_v19, -inf }
 0x1e2   :  { %v65_v20 = vsel %vm63_vm7, %v27_v0, 0.0 }
 0x1e3   :  { %67 = vst [vmem:[#allocation5] sm:$0xff] %v65_v20 }
 0x1e6   :  { %v58_v21 = vpop.xlane.xlu1 %57 }
 0x1e7   :  { %vm60_vm8 = vcmp.eq.s32.totalorder %v26_v5, %v58_v21 }
 0x1e8   :  { %v62_v22 = vsel %vm60_vm8, -inf, %v54_v17 }
 0x1e9   :  { %vm64_vm9 = vcmp.eq.f32.partialorder %v62_v22, -inf }
 0x1ea   :  { %v66_v23 = vsel %vm64_vm9, %v28_v2, 0.0 }
 0x1eb   :  { %68 = vst [vmem:[#allocation5 + $0x8] sm:$0xff] %v66_v23 }
 0x1ec   :  { %81 = dma.vmem_to_hbm [thread:$0]  %s74_s13, 256, %s76_s16, [#allocation4], %s145_s11, %s145_s11, %s146_s12  }
 0x1ed   :  { %142 = dma.done.wait [#allocation4], 256  }
 0x1ee   :  { %143 = vsyncadd [#allocation4], 4294967040 }
 0x1ef   :  { %86 = vsyncpa [#allocation3], 1 }
 0x1f0   :  { %87 = vsyncpa [#allocation4], 1 }

</bundles_post_ra>
